<compile_context>
chip_gen: v6e
topology: v6e:2x2x1
jax: 0.10.0
libtpu: 0.0.40
codegen_flags: <defaults>
</compile_context>

<pallas_src>
import jax
import jax.numpy as jnp
from jax.experimental import pallas as pl
from jax.experimental.pallas import tpu as pltpu


def _expert_kernel(x_ref, w_ref, b_ref, o_ref):
    # x_ref: (C, TILE_N, HW_p) f32 — channel axis leading (no sublane padding)
    # w_ref: (HW_p, OUT_p)     f32 — transposed PyTorch weight, pre-scaled by 1/C
    # b_ref: (1, OUT_p)        f32
    # o_ref: (TILE_N, OUT_p)   f32 — lane-dense (OUT_p multiple of 128)
    s = jnp.sum(x_ref[...], axis=0)                       # channel sum (VALU)
    out = jnp.dot(s, w_ref[...],
                  preferred_element_type=jnp.float32)     # MXU matmul
    o_ref[...] = out + b_ref[...]                         # broadcast bias


def _round_up(x, m):
    return ((x + m - 1) // m) * m


def _choose_tile_n(n_p8, c, hw_p, out_p, budget_bytes=40 * 1024 * 1024):
    """Largest multiple-of-8 TILE_N whose double-buffered footprint fits budget."""
    w_bytes = 2 * hw_p * out_p * 4          # weight (conservatively 2x buffered)
    b_bytes = 2 * out_p * 4
    per_row = 2 * (c * hw_p + out_p) * 4    # double-buffered x tile + out tile
    avail = max(budget_bytes - w_bytes - b_bytes, per_row * 8)
    tile_n = max(8, (avail // per_row) // 8 * 8)
    tile_n = min(tile_n, 512)               # >=512-class tiles hit ~85% of HBM roofline
    tile_n = min(tile_n, n_p8)
    return int(tile_n)


def basic_expert_net(img, weight, bias):
    """img: (N, C, H, W); weight: (OUT, H*W) [PyTorch layout]; bias: (OUT,)."""
    n, c, h, w = img.shape
    hw = h * w
    out_dim = weight.shape[0]

    # Lane / sublane padding.
    hw_p = _round_up(hw, 128)
    out_p = max(128, _round_up(out_dim, 128))
    n_p8 = _round_up(n, 8)

    tile_n = _choose_tile_n(n_p8, c, hw_p, out_p)
    n_p = _round_up(n_p8, tile_n)

    # Layout: (N, C, H, W) -> (C, N, HW), f32, zero-padded on N and HW.
    x = jnp.transpose(img.reshape(n, c, hw), (1, 0, 2)).astype(jnp.float32)
    x = jnp.pad(x, ((0, 0), (0, n_p - n), (0, hw_p - hw)))

    # Transposed weight with 1/C folded in (mean = sum * 1/C), zero-padded.
    w_t = weight.T.astype(jnp.float32) * (1.0 / c)           # (HW, OUT)
    w_t = jnp.pad(w_t, ((0, hw_p - hw), (0, out_p - out_dim)))

    b = jnp.pad(bias.astype(jnp.float32), (0, out_p - out_dim)).reshape(1, out_p)

    grid = (pl.cdiv(n_p, tile_n),)

    out = pl.pallas_call(
        _expert_kernel,
        out_shape=jax.ShapeDtypeStruct((n_p, out_p), jnp.float32),
        grid_spec=pltpu.PrefetchScalarGridSpec(
            num_scalar_prefetch=0,
            grid=grid,
            in_specs=[
                # x: new N-block per step; full C and HW per block.
                pl.BlockSpec((c, tile_n, hw_p), lambda i: (0, i, 0)),
                # weight / bias: constant index map -> stay VMEM-resident.
                pl.BlockSpec((hw_p, out_p), lambda i: (0, 0)),
                pl.BlockSpec((1, out_p), lambda i: (0, 0)),
            ],
            out_specs=pl.BlockSpec((tile_n, out_p), lambda i: (i, 0)),
        ),
        compiler_params=pltpu.CompilerParams(
            dimension_semantics=("parallel",),          # megacore sharding on v7x
            vmem_limit_bytes=48 * 1024 * 1024,          # safe on v7x's 64 MiB/TC
        ),
    )(x, w_t, b)

    return out[:n, :out_dim]


if __name__ == "__main__":
    # Small shapes consistent with the module:
    #   input_size = 16 (image is input_size x input_size), output_size = 8
    N, C, INPUT_SIZE, OUT = 2, 4, 16, 8

    key = jax.random.PRNGKey(0)
    k_img, k_w, k_b = jax.random.split(key, 3)

    img = jax.random.normal(k_img, (N, C, INPUT_SIZE, INPUT_SIZE), jnp.float32)

    # Deterministic parameter init (matching nn.Linear's uniform bound 1/sqrt(fan_in)).
    fan_in = INPUT_SIZE * INPUT_SIZE
    bound = 1.0 / jnp.sqrt(jnp.float32(fan_in))
    weight = jax.random.uniform(k_w, (OUT, fan_in), jnp.float32, -bound, bound)
    bias = jax.random.uniform(k_b, (OUT,), jnp.float32, -bound, bound)

    out = basic_expert_net(img, weight, bias)
    jax.block_until_ready(out)

    # Pure-JAX reference check of the same math.
    ref = img.mean(axis=1).reshape(N, -1) @ weight.T + bias
    assert out.shape == (N, OUT)
    assert jnp.allclose(out, ref, atol=1e-5, rtol=1e-5)

    print("KERNEL_OK")
</pallas_src>

<mosaic_0001>
module attributes {stable_mosaic.version = 11 : i64} {
  func.func @_expert_kernel(%arg0: i32, %arg1: memref<4x8x256xf32, #tpu.memory_space<vmem>>, %arg2: memref<256x128xf32, #tpu.memory_space<vmem>>, %arg3: memref<1x128xf32, #tpu.memory_space<vmem>>, %arg4: memref<8x128xf32, #tpu.memory_space<vmem>>) attributes {dimension_semantics = [#tpu.dimension_semantics<parallel>], iteration_bounds = array<i64: 1>, scalar_prefetch = 0 : i64, scratch_operands = 0 : i64, tpu.core_type = #tpu.core_type<tc>, window_params = [{transform_indices = @transform_0, window_bounds = array<i64: 4, 8, 256>}, {pipeline_mode = #tpu.pipeline_mode<synchronous>, transform_indices = @transform_1, window_bounds = array<i64: 256, 128>}, {pipeline_mode = #tpu.pipeline_mode<synchronous>, transform_indices = @transform_2, window_bounds = array<i64: 1, 128>}, {transform_indices = @transform_3, window_bounds = array<i64: 8, 128>}]} {
    %c0 = arith.constant 0 : index
    %c0_0 = arith.constant 0 : index
    %c0_1 = arith.constant 0 : index
    %0 = vector.load %arg1[%c0, %c0_0, %c0_1] : memref<4x8x256xf32, #tpu.memory_space<vmem>>, vector<4x8x256xf32>
    %cst = arith.constant dense<0.000000e+00> : vector<8x256xf32>
    %1 = vector.multi_reduction <add>, %0, %cst [0] : vector<4x8x256xf32> to vector<8x256xf32>
    %c0_2 = arith.constant 0 : index
    %c0_3 = arith.constant 0 : index
    %2 = vector.load %arg2[%c0_2, %c0_3] : memref<256x128xf32, #tpu.memory_space<vmem>>, vector<256x128xf32>
    %cst_4 = arith.constant dense<0.000000e+00> : vector<8x128xf32>
    %3 = tpu.matmul %1, %2, %cst_4 {dimension_numbers = #tpu.dot_dimension_numbers<[1], [0], [0], [1], [0, 0, 1, 1], [], []>} : vector<8x256xf32>, vector<256x128xf32>, vector<8x128xf32> -> vector<8x128xf32>
    %c0_5 = arith.constant 0 : index
    %c0_6 = arith.constant 0 : index
    %4 = vector.load %arg3[%c0_5, %c0_6] : memref<1x128xf32, #tpu.memory_space<vmem>>, vector<1x128xf32>
    %5 = vector.broadcast %4 : vector<1x128xf32> to vector<8x128xf32>
    %6 = arith.addf %3, %5 : vector<8x128xf32>
    %c0_7 = arith.constant 0 : index
    %c0_8 = arith.constant 0 : index
    %7 = vector.load %arg4[%c0_7, %c0_8] : memref<8x128xf32, #tpu.memory_space<vmem>>, vector<8x128xf32>
    tpu.vector_store %arg4[%c0_7, %c0_8], %6 {strides = array<i32>} : memref<8x128xf32, #tpu.memory_space<vmem>>, vector<8x128xf32>,
    return
  }
  func.func @transform_0(%arg0: i32) -> (i32, i32, i32) {
    %c0_i32 = arith.constant 0 : i32
    %c0_i32_0 = arith.constant 0 : i32
    %c0_i32_1 = arith.constant 0 : i32
    return %c0_i32, %arg0, %c0_i32_0 : i32, i32, i32
  }
  func.func @transform_1(%arg0: i32) -> (i32, i32) {
    %c0_i32 = arith.constant 0 : i32
    %c0_i32_0 = arith.constant 0 : i32
    %c0_i32_1 = arith.constant 0 : i32
    return %c0_i32, %c0_i32_0 : i32, i32
  }
  func.func @transform_2(%arg0: i32) -> (i32, i32) {
    %c0_i32 = arith.constant 0 : i32
    %c0_i32_0 = arith.constant 0 : i32
    %c0_i32_1 = arith.constant 0 : i32
    return %c0_i32, %c0_i32_0 : i32, i32
  }
  func.func @transform_3(%arg0: i32) -> (i32, i32) {
    %c0_i32 = arith.constant 0 : i32
    %c0_i32_0 = arith.constant 0 : i32
    return %arg0, %c0_i32 : i32, i32
  }
}

</mosaic_0001>

<bundles_post_ra>
// kernel: tpu_custom_call.1
= control target key start
LH: loop header
LB: loop body
LE: loop exit
PB: predicated region body
PF: predicated region fallthrough
CT: control target
= control target key end

     0   :  { %8 = vsyncpa [#allocation3], 0  ;;  %s331_s0 = inlined_call_operand.hbm [shape: f32[4,8,256], index: 0, kind: input, shape index: {}]   ;;  %s332_s1 = inlined_call_operand.hbm [shape: f32[256,128], index: 1, kind: input, shape index: {}]   ;;  %s333_s2 = inlined_call_operand.vmem [shape: f32[1,128], index: 2, kind: input, shape index: {}]   ;;  %s334_s3 = inlined_call_operand.hbm [shape: f32[8,128], index: 3, kind: output, shape index: {}]  }
   0x1   :  { %9 = vsyncpa [#allocation6], 0 }
   0x2   :  { %10 = vsyncpa [#allocation4], 0  ;;  %s292_s12 = smov [#allocation2]  }
   0x3   :  { %s16_s13 = sshll.u32 %s292_s12, 4  ;;  %s17_s13 = int_to_ptr.vmem [resolvable:$true] %s16_s13 }
   0x4   :  { %s234_s14 = scalar_lea.vmem %s17_s13, 1024  ;;  %p239_p1 = scmp.lt.s32.totalorder %s17_s13, %s17_s13 }
   0x5   :  { %p235_p0 = scmp.ne.s32.totalorder %s17_s13, %s234_s14  ;;  %p240_p2 = scmp.lt.s32.totalorder %s234_s14, %s234_s14 }
   0x7   :  { %p241_p3 = por %p240_p2, %p239_p1 }
   0x9   :  { %p242_p4 = pnand %p241_p3, %p235_p0 }
   0xb   :  { %245 = shalt.err (!%p242_p4)
}
   0xc   :  { %s293_s15 = smov 256   ;;  %s294_s16 = smov 16  }
   0xd   :  { %22 = dma.hbm_to_vmem [thread:$0]  %s331_s0, 1024, %s17_s13, [#allocation3], %s293_s15, %s293_s15, %s294_s16  }
   0xe   :  { %s295_s19 = smov [#allocation5]  }
   0xf   :  { %s28_s20 = sshll.u32 %s295_s19, 4  ;;  %s29_s20 = int_to_ptr.vmem [resolvable:$true] %s28_s20 }
  0x10   :  { %s254_s21 = scalar_lea.vmem %s29_s20, 4096  ;;  %p259_p6 = scmp.lt.s32.totalorder %s29_s20, %s29_s20 }
  0x11   :  { %p255_p5 = scmp.ne.s32.totalorder %s29_s20, %s254_s21  ;;  %p260_p7 = scmp.lt.s32.totalorder %s254_s21, %s254_s21 }
  0x13   :  { %p261_p8 = por %p260_p7, %p259_p6 }
  0x15   :  { %p262_p9 = pnand %p261_p8, %p255_p5 }
  0x17   :  { %265 = shalt.err (!%p262_p9)
}
  0x18   :  { %s296_s22 = smov 128   ;;  %s297_s23 = smov 8  }
  0x19   :  { %34 = dma.hbm_to_vmem [thread:$0]  %s332_s1, 4096, %s29_s20, [#allocation6], %s296_s22, %s296_s22, %s297_s23  }
  0x1a   :  { %286 = dma.done.wait [#allocation3], 1024  }
  0x1b   :  { %287 = vsyncadd [#allocation3], 4294966272 }
  0x1c   :  { %288 = dma.done.wait [#allocation6], 4096  }
  0x1d   :  { %289 = vsyncadd [#allocation6], 4294963200  ;;  %v88_v0 = vld [vmem:[#allocation5 + $0xf8] sm:$0xff]  ;;  %v87_v2 = vld [vmem:[#allocation5 + $0xf0] sm:$0xff]  ;;  %s298_s26 = smov [#allocation7]  }
  0x1e   :  { %v72_v1 = vld [vmem:[#allocation5 + $0x78] sm:$0xff]  ;;  %184 = vmatprep.subr.mxu0 %v88_v0  ;;  %v71_v3 = vld [vmem:[#allocation5 + $0x70] sm:$0xff]  ;;  %v86_v4 = vld [vmem:[#allocation5 + $0xe8] sm:$0xff]  ;;  %s173_s27 = sshll.u32 %s298_s26, 4  ;;  %s174_s27 = int_to_ptr.vmem [resolvable:$true] %s173_s27 }
  0x1f   :  { %185 = vmatpush3.msra.mxu0 %v72_v1  ;;  %v70_v5 = vld [vmem:[#allocation5 + $0x68] sm:$0xff]  ;;  %v85_v6 = vld [vmem:[#allocation5 + $0xe0] sm:$0xff]  ;;  %v84_v8 = vld [vmem:[#allocation5 + $0xd8] sm:$0xff]  ;;  %s266_s28 = scalar_lea.vmem %s174_s27, 128  ;;  %p271_p11 = scmp.lt.s32.totalorder %s174_s27, %s174_s27 }
  0x20   :  { %186 = vmatprep.subr.mxu0 %v87_v2  ;;  %v69_v7 = vld [vmem:[#allocation5 + $0x60] sm:$0xff]  ;;  %v68_v9 = vld [vmem:[#allocation5 + $0x58] sm:$0xff]  ;;  %v83_v10 = vld [vmem:[#allocation5 + $0xd0] sm:$0xff]  ;;  %p267_p10 = scmp.ne.s32.totalorder %s174_s27, %s266_s28  ;;  %p272_p12 = scmp.lt.s32.totalorder %s266_s28, %s266_s28 }
  0x21   :  { %187 = vmatpush3.msra.mxu0 %v71_v3  ;;  %v67_v11 = vld [vmem:[#allocation5 + $0x50] sm:$0xff]  ;;  %v82_v12 = vld [vmem:[#allocation5 + $0xc8] sm:$0xff]  ;;  %v46_v15 = vld [vmem:[#allocation2 + $0x18] sm:$0xff] }
  0x22   :  { %188 = vmatprep.subr.mxu0 %v86_v4  ;;  %v44_v13 = vld [vmem:[#allocation2 + $0x8] sm:$0xff]  ;;  %v81_v17 = vld [vmem:[#allocation5 + $0xc0] sm:$0xff]  ;;  %v50_v20 = vld [vmem:[#allocation2 + $0x38] sm:$0xff]  ;;  %p273_p13 = por %p272_p12, %p271_p11 }
  0x23   :  { %189 = vmatpush3.msra.mxu0 %v70_v5  ;;  %v66_v14 = vld [vmem:[#allocation5 + $0x48] sm:$0xff]  ;;  %v54_v18 = vadd.f32 %v46_v15, %v44_v13  ;;  %v65_v19 = vld [vmem:[#allocation5 + $0x40] sm:$0xff]  ;;  %v80_v21 = vld [vmem:[#allocation5 + $0xb8] sm:$0xff] }
  0x24   :  { %190 = vmatprep.subr.mxu0 %v85_v6  ;;  %v48_v16 = vld [vmem:[#allocation2 + $0x28] sm:$0xff]  ;;  %v64_v23 = vld [vmem:[#allocation5 + $0x38] sm:$0xff]  ;;  %v79_v24 = vld [vmem:[#allocation5 + $0xb0] sm:$0xff]  ;;  %p274_p0 = pnand %p273_p13, %p267_p10 }
  0x25   :  { %191 = vmatpush3.msra.mxu0 %v69_v7  ;;  %v55_v22 = vadd.f32 %v54_v18, %v48_v16  ;;  %v63_v26 = vld [vmem:[#allocation5 + $0x30] sm:$0xff]  ;;  %v78_v27 = vld [vmem:[#allocation5 + $0xa8] sm:$0xff]  ;;  %v43_v28 = vld [vmem:[#allocation2] sm:$0xff] }
  0x26   :  { %192 = vmatprep.subr.mxu0 %v84_v8  ;;  %v45_v29 = vld [vmem:[#allocation2 + $0x10] sm:$0xff]  ;;  %v62_v30 = vld [vmem:[#allocation5 + $0x28] sm:$0xff]  ;;  %v77_v31 = vld [vmem:[#allocation5 + $0xa0] sm:$0xff] }
  0x27   :  { %193 = vmatpush3.msra.mxu0 %v68_v9  ;;  %v56_v25 = vadd.f32 %v55_v22, %v50_v20  ;;  %v61_v32 = vld [vmem:[#allocation5 + $0x20] sm:$0xff]  ;;  %v51_v33 = vadd.f32 %v45_v29, %v43_v28  ;;  %v76_v34 = vld [vmem:[#allocation5 + $0x98] sm:$0xff]  ;;  %v75_v37 = vld [vmem:[#allocation5 + $0x90] sm:$0xff] }
  0x28   :  { %194 = vmatprep.subr.mxu0 %v83_v10  ;;  %v47_v35 = vld [vmem:[#allocation2 + $0x20] sm:$0xff]  ;;  %v60_v36 = vld [vmem:[#allocation5 + $0x18] sm:$0xff]  ;;  %v59_v38 = vld [vmem:[#allocation5 + $0x10] sm:$0xff] }
  0x29   :  { %195 = vmatpush3.msra.mxu0 %v67_v11  ;;  %160 = vmatprep.mubr.f32.mxu0 %v56_v25  ;;  %v52_v39 = vadd.f32 %v51_v33, %v47_v35  ;;  %v74_v40 = vld [vmem:[#allocation5 + $0x88] sm:$0xff]  ;;  %v49_v41 = vld [vmem:[#allocation2 + $0x30] sm:$0xff]  ;;  %v73_v43 = vld [vmem:[#allocation5 + $0x80] sm:$0xff] }
  0x2a   :  { %196 = vmatprep.subr.mxu0 %v82_v12  ;;  %v58_v42 = vld [vmem:[#allocation5 + $0x8] sm:$0xff]  ;;  %v57_v44 = vld [vmem:[#allocation5] sm:$0xff] }
  0x2b   :  { %197 = vmatpush3.msra.mxu0 %v66_v14  ;;  %v53_v45 = vadd.f32 %v52_v39, %v49_v41  ;;  %v183_v47 = vld [vmem:[%s333_s2] ss:$0 sm:$0xff] }
  0x2c   :  { %198 = vmatprep.subr.mxu0 %v81_v17 }
  0x2d   :  { %199 = vmatpush3.msra.mxu0 %v65_v19 }
  0x2e   :  { %200 = vmatprep.subr.mxu0 %v80_v21 }
  0x2f   :  { %201 = vmatpush3.msra.mxu0 %v64_v23 }
  0x30   :  { %202 = vmatprep.subr.mxu0 %v79_v24 }
  0x31   :  { %203 = vmatpush3.msra.mxu0 %v63_v26 }
  0x32   :  { %204 = vmatprep.subr.mxu0 %v78_v27 }
  0x33   :  { %205 = vmatpush3.msra.mxu0 %v62_v30 }
  0x34   :  { %206 = vmatprep.subr.mxu0 %v77_v31 }
  0x35   :  { %207 = vmatpush3.msra.mxu0 %v61_v32 }
  0x36   :  { %208 = vmatprep.subr.mxu0 %v76_v34 }
  0x37   :  { %209 = vmatpush3.msra.mxu0 %v60_v36 }
  0x38   :  { %210 = vmatprep.subr.mxu0 %v75_v37 }
  0x39   :  { %211 = vmatpush3.msra.mxu0 %v59_v38 }
  0x3a   :  { %212 = vmatprep.subr.mxu0 %v74_v40 }
  0x3b   :  { %213 = vmatpush3.msra.mxu0 %v58_v42 }
  0x3c   :  { %214 = vmatprep.subr.mxu0 %v73_v43 }
  0x3d   :  { %215 = vmatpush3.msra.mxu0 %v57_v44 }
  0x3e   :  { %161 = vmatmul.mubr.f32.vlgmr.msra.gmra.mxu0 %v53_v45 }
  0xfe   :  { %v216_v46 = vpop.f32.mrf.mxu0 }
 0x100   :  { %v217_v48 = vpop.f32.mrf.mxu0 }
 0x101   :  { %v218_v49 = vadd.f32 %v217_v48, %v216_v46 }
 0x103   :  { %v163_v50 = vadd.f32 %v218_v49, %v183_v47 }
 0x105   :  { %166 = vst [vmem:[#allocation7] sm:$0xff] %v163_v50 }
 0x106   :  { %277 = shalt.err (!%p274_p0)
}
 0x107   :  { %176 = dma.vmem_to_hbm [thread:$0]  %s174_s27, 128, %s334_s3, [#allocation4]  }
 0x108   :  { %290 = dma.done.wait [#allocation4], 128  }
 0x109   :  { %291 = vsyncadd [#allocation4], 4294967168 }
 0x10a   :  { %180 = vsyncpa [#allocation3], 1 }
 0x10b   :  { %181 = vsyncpa [#allocation6], 1 }
 0x10c   :  { %182 = vsyncpa [#allocation4], 1 }

</bundles_post_ra>
